<compile_context>
chip_gen: v6e
topology: v6e:2x2x1
jax: 0.10.0
libtpu: 0.0.40
codegen_flags: <defaults>
</compile_context>

<pallas_src>
import functools

import jax
import jax.numpy as jnp
from jax.experimental import pallas as pl
from jax.experimental.pallas import tpu as pltpu

NEG_SLOPE = 0.2      # PyG GATConv default negative_slope
LANES = 128          # lane width to pad feature dims to
NEG_BIAS = -1e30     # additive mask bias for non-edges (representable in bf16)


def _round_up(x, m):
    return ((x + m - 1) // m) * m


# --------------------------------------------------------------------------- #
# Kernel 1: per row-tile linear transform + per-node attention scores.
# --------------------------------------------------------------------------- #
def _transform_kernel(h_ref, w_ref, asrc_ref, adst_ref, hb_ref, s_ref, d_ref):
    # h_ref:   [TQ, CIN]  f32     w_ref: [CIN, COUT] bf16 (resident)
    # asrc/adst: [1, COUT] f32 (resident)
    # hb_ref:  [TQ, COUT] bf16    s_ref/d_ref: [TQ, 1] f32
    hb = jnp.dot(h_ref[...].astype(jnp.bfloat16), w_ref[...],
                 preferred_element_type=jnp.float32)                 # MXU
    hb_ref[...] = hb.astype(jnp.bfloat16)
    # Per-node scores via VPU multiply + lane reduce (no 2-lane MXU output).
    s_ref[...] = jnp.sum(hb * asrc_ref[...], axis=1, keepdims=True)  # source score
    d_ref[...] = jnp.sum(hb * adst_ref[...], axis=1, keepdims=True)  # dest   score


# --------------------------------------------------------------------------- #
# Kernel 2: flash-style edge-softmax + aggregation over key tiles.
# --------------------------------------------------------------------------- #
def _attention_kernel(scale_ref, d_ref, s_ref, hb_ref, adj_ref, b_ref, out_ref,
                      m_sc, l_sc, acc_sc, *, apply_act, use_bf16_exp):
    # scale_ref: SMEM (1,1) f32           d_ref: [TQ,1] f32    s_ref: [1,TK] f32
    # hb_ref: [TK,COUT] bf16 (key/value)  adj_ref: [TQ,TK] bf16 additive bias
    # b_ref:  [1,COUT] f32 (resident)     out_ref: [TQ,COUT] f32
    ki = pl.program_id(1)

    @pl.when(ki == 0)
    def _():
        m_sc[...] = jnp.full_like(m_sc, -jnp.inf)
        l_sc[...] = jnp.zeros_like(l_sc)
        acc_sc[...] = jnp.zeros_like(acc_sc)

    # e[i, j] = leaky_relu(d_i + s_j) + adj_bias[i, j]
    e = d_ref[...] + s_ref[...]                       # [TQ,1]+[1,TK] -> [TQ,TK]
    e = jnp.maximum(e, NEG_SLOPE * e)                 # leaky relu, no select
    e = e + adj_ref[...].astype(jnp.float32)          # mask folded into one add

    m_prev = m_sc[...]
    m_new = jnp.maximum(m_prev, jnp.max(e, axis=1, keepdims=True))
    alpha = jnp.exp(m_prev - m_new)                   # 0 on first step (m_prev=-inf)

    if use_bf16_exp:
        # bf16 EUP path (v6e / v7x): no second N^2 cast before the MXU dot.
        p = jnp.exp((e - m_new).astype(jnp.bfloat16))
        row_sum = jnp.sum(p.astype(jnp.float32), axis=1, keepdims=True)
        pv = p
    else:
        p = jnp.exp(e - m_new)                        # non-edges underflow to 0
        row_sum = jnp.sum(p, axis=1, keepdims=True)
        pv = p.astype(jnp.bfloat16)

    l_sc[...] = alpha * l_sc[...] + row_sum
    acc_sc[...] = alpha * acc_sc[...] + jnp.dot(pv, hb_ref[...],
                                                preferred_element_type=jnp.float32)
    m_sc[...] = m_new

    @pl.when(ki == pl.num_programs(1) - 1)
    def _():
        out = acc_sc[...] / l_sc[...] + b_ref[...]    # exact normalization
        if apply_act:
            # Curvature enhancement + ReLU (dropout: eval-mode identity).
            out = jnp.maximum(out * scale_ref[0, 0], 0.0)
        out_ref[...] = out


# --------------------------------------------------------------------------- #
# One GAT layer = transform pass + flash attention pass.
# --------------------------------------------------------------------------- #
def _gat_layer(h, adj_bias, w, a_src, a_dst, bias, scale, *, apply_act,
               use_bf16_exp, tile):
    n_pad, cin_p = h.shape
    f_in, f_out = w.shape
    cout_p = _round_up(f_out, LANES)
    n_q = n_pad // tile

    # Per-layer padded parameters (no max-dim stacking).
    w_p = jnp.zeros((cin_p, cout_p), jnp.bfloat16)
    w_p = w_p.at[:f_in, :f_out].set(w.astype(jnp.bfloat16))
    asrc_p = jnp.zeros((1, cout_p), jnp.float32)
    asrc_p = asrc_p.at[0, :f_out].set(a_src.reshape(-1).astype(jnp.float32))
    adst_p = jnp.zeros((1, cout_p), jnp.float32)
    adst_p = adst_p.at[0, :f_out].set(a_dst.reshape(-1).astype(jnp.float32))
    b_p = jnp.zeros((1, cout_p), jnp.float32)
    b_p = b_p.at[0, :f_out].set(bias.reshape(-1).astype(jnp.float32))

    # ---- pass 1: hb = h @ W, per-node src/dst scores ------------------------
    hb, s_col, d_col = pl.pallas_call(
        _transform_kernel,
        out_shape=(jax.ShapeDtypeStruct((n_pad, cout_p), jnp.bfloat16),
                   jax.ShapeDtypeStruct((n_pad, 1), jnp.float32),
                   jax.ShapeDtypeStruct((n_pad, 1), jnp.float32)),
        grid_spec=pltpu.PrefetchScalarGridSpec(
            num_scalar_prefetch=0,
            grid=(n_q,),
            in_specs=[
                pl.BlockSpec((tile, cin_p), lambda i: (i, 0)),    # h rows
                pl.BlockSpec((cin_p, cout_p), lambda i: (0, 0)),  # W (resident)
                pl.BlockSpec((1, cout_p), lambda i: (0, 0)),      # att_src
                pl.BlockSpec((1, cout_p), lambda i: (0, 0)),      # att_dst
            ],
            out_specs=[
                pl.BlockSpec((tile, cout_p), lambda i: (i, 0)),   # hb
                pl.BlockSpec((tile, 1), lambda i: (i, 0)),        # s (column)
                pl.BlockSpec((tile, 1), lambda i: (i, 0)),        # d (column)
            ]),
        compiler_params=pltpu.CompilerParams(
            dimension_semantics=("parallel",)),
    )(h, w_p, asrc_p, adst_p)

    # Column -> row for lane-broadcast in the attention kernel (free reshape).
    s_row = s_col.reshape(1, n_pad)

    # ---- pass 2: flash-style edge softmax + aggregation ---------------------
    attn_kernel = functools.partial(_attention_kernel, apply_act=apply_act,
                                    use_bf16_exp=use_bf16_exp)
    flops = 2 * n_pad * n_pad * cout_p + 8 * n_pad * n_pad
    bytes_accessed = (n_pad * n_pad * 2                       # adj bias tiles
                      + n_q * n_pad * cout_p * 2              # hb key tiles
                      + n_pad * cout_p * 4                    # output
                      + 2 * n_pad * 4)                        # s, d
    out = pl.pallas_call(
        attn_kernel,
        out_shape=jax.ShapeDtypeStruct((n_pad, cout_p), jnp.float32),
        grid_spec=pltpu.PrefetchScalarGridSpec(
            num_scalar_prefetch=0,
            grid=(n_q, n_q),
            in_specs=[
                pl.BlockSpec(memory_space=pltpu.MemorySpace.SMEM),      # scale
                pl.BlockSpec((tile, 1), lambda qi, ki: (qi, 0)),        # d_i column
                pl.BlockSpec((1, tile), lambda qi, ki: (0, ki)),        # s_j row
                pl.BlockSpec((tile, cout_p), lambda qi, ki: (ki, 0)),   # hb keys
                pl.BlockSpec((tile, tile), lambda qi, ki: (qi, ki)),    # adj bias
                pl.BlockSpec((1, cout_p), lambda qi, ki: (0, 0)),       # layer bias
            ],
            out_specs=pl.BlockSpec((tile, cout_p), lambda qi, ki: (qi, 0)),
            scratch_shapes=[pltpu.VMEM((tile, 1), jnp.float32),         # m
                            pltpu.VMEM((tile, 1), jnp.float32),         # l
                            pltpu.VMEM((tile, cout_p), jnp.float32)]),  # acc
        compiler_params=pltpu.CompilerParams(
            dimension_semantics=("parallel", "arbitrary")),
        cost_estimate=pl.CostEstimate(flops=flops,
                                      transcendentals=n_pad * n_pad,
                                      bytes_accessed=bytes_accessed),
    )(scale, d_col, s_row, hb, adj_bias, b_p)
    return out


# --------------------------------------------------------------------------- #
# Wrapper
# --------------------------------------------------------------------------- #
def _build_adj_bias(edge_index, n_pad):
    """Additive bf16 bias: 0 on edges j->i and self-loops, -1e30 elsewhere.
    Built directly in bf16 (no f32 scatter / eye / max pre-pass)."""
    src = edge_index[0].astype(jnp.int32)
    dst = edge_index[1].astype(jnp.int32)
    adj = jnp.full((n_pad, n_pad), NEG_BIAS, dtype=jnp.bfloat16)
    adj = adj.at[dst, src].set(0.0)                  # edge j -> i
    idx = jnp.arange(n_pad, dtype=jnp.int32)
    adj = adj.at[idx, idx].set(0.0)                  # self-loops (incl. padded rows)
    return adj


def init_params(key, in_features, hidden_features, out_features, num_layers=3):
    """Glorot-style init matching PyG GATConv parameter shapes (heads=1):
    W:[F_in, C], att_src/att_dst:[C, 1], bias:[1, C]."""
    dims = [(in_features, hidden_features)]
    for _ in range(num_layers - 2):
        dims.append((hidden_features, hidden_features))
    dims.append((hidden_features, out_features))

    params = []
    for (f_in, f_out) in dims:
        key, k_w, k_s, k_d = jax.random.split(key, 4)
        std_w = (2.0 / (f_in + f_out)) ** 0.5
        std_a = (2.0 / (f_out + 1)) ** 0.5
        w = std_w * jax.random.normal(k_w, (f_in, f_out), jnp.float32)
        a_src = std_a * jax.random.normal(k_s, (f_out, 1), jnp.float32)
        a_dst = std_a * jax.random.normal(k_d, (f_out, 1), jnp.float32)
        bias = jnp.zeros((1, f_out), jnp.float32)
        params.append((w, a_src, a_dst, bias))
    return params


def curvature_enhanced_gat_forward(x, edge_index, curvature_weights, params,
                                   gamma=0.3):
    n, f_in0 = x.shape
    num_layers = len(params)
    out_features = params[-1][0].shape[1]

    # bf16 exp only where the EUP has a bf16 path (v6e / v7x); f32 elsewhere.
    kind = jax.devices()[0].device_kind.lower()
    use_bf16_exp = any(tag in kind for tag in ("v6", "v7", "7x"))

    # Row tile: fill the MXU row dimension (>=128; 256 when the graph allows it).
    tile = 256 if n > 128 else 128
    n_pad = _round_up(n, tile)

    adj_bias = _build_adj_bias(edge_index, n_pad)

    # Pad node features: rows to n_pad, feature width to a lane-dense multiple.
    cin_p = _round_up(f_in0, LANES)
    h = jnp.zeros((n_pad, cin_p), jnp.float32)
    h = h.at[:n, :f_in0].set(x.astype(jnp.float32))

    # Curvature factor 1 + gamma * mean(curvature) as SMEM scalar.
    if curvature_weights is not None:
        factor = 1.0 + gamma * jnp.mean(curvature_weights.astype(jnp.float32))
    else:
        factor = jnp.float32(1.0)
    scale = jnp.reshape(factor, (1, 1)).astype(jnp.float32)

    for l, (w, a_src, a_dst, bias) in enumerate(params):
        h = _gat_layer(h, adj_bias, w, a_src, a_dst, bias, scale,
                       apply_act=(l < num_layers - 1),
                       use_bf16_exp=use_bf16_exp, tile=tile)

    return h[:n, :out_features]


if __name__ == "__main__":
    key = jax.random.PRNGKey(0)

    # Small, deterministic graph: N nodes, each node i has 4 outgoing edges
    # to (i+1), (i+3), (i+7), (i+11) mod N -> E = 4N distinct edges, no dups.
    N = 64
    IN_FEATURES = 16
    HIDDEN_FEATURES = 32
    OUT_FEATURES = 8
    offsets = jnp.array([1, 3, 7, 11], dtype=jnp.int32)
    src = jnp.repeat(jnp.arange(N, dtype=jnp.int32), offsets.shape[0])
    dst = (src + jnp.tile(offsets, N)) % N
    edge_index = jnp.stack([src, dst], axis=0)            # [2, E], E = 256
    E = edge_index.shape[1]

    key, k_x, k_c, k_p = jax.random.split(key, 4)
    x = jax.random.normal(k_x, (N, IN_FEATURES), jnp.float32)
    curvature_weights = jax.random.uniform(k_c, (E,), jnp.float32)

    params = init_params(k_p, IN_FEATURES, HIDDEN_FEATURES, OUT_FEATURES,
                         num_layers=3)

    out = curvature_enhanced_gat_forward(x, edge_index, curvature_weights,
                                         params, gamma=0.3)
    out = jax.block_until_ready(out)
    assert out.shape == (N, OUT_FEATURES), out.shape
    assert jnp.all(jnp.isfinite(out))
    print("KERNEL_OK")
</pallas_src>

<mosaic_0001>
module attributes {stable_mosaic.version = 11 : i64} {
  func.func @_transform_kernel(%arg0: i32, %arg1: memref<128x128xf32, #tpu.memory_space<vmem>>, %arg2: memref<128x128xbf16, #tpu.memory_space<vmem>>, %arg3: memref<1x128xf32, #tpu.memory_space<vmem>>, %arg4: memref<1x128xf32, #tpu.memory_space<vmem>>, %arg5: memref<128x128xbf16, #tpu.memory_space<vmem>>, %arg6: memref<128x1xf32, #tpu.memory_space<vmem>>, %arg7: memref<128x1xf32, #tpu.memory_space<vmem>>) attributes {dimension_semantics = [#tpu.dimension_semantics<parallel>], iteration_bounds = array<i64: 1>, scalar_prefetch = 0 : i64, scratch_operands = 0 : i64, tpu.core_type = #tpu.core_type<tc>, window_params = [{transform_indices = @transform_0, window_bounds = array<i64: 128, 128>}, {pipeline_mode = #tpu.pipeline_mode<synchronous>, transform_indices = @transform_1, window_bounds = array<i64: 128, 128>}, {pipeline_mode = #tpu.pipeline_mode<synchronous>, transform_indices = @transform_2, window_bounds = array<i64: 1, 128>}, {pipeline_mode = #tpu.pipeline_mode<synchronous>, transform_indices = @transform_3, window_bounds = array<i64: 1, 128>}, {transform_indices = @transform_4, window_bounds = array<i64: 128, 128>}, {transform_indices = @transform_5, window_bounds = array<i64: 128, 1>}, {transform_indices = @transform_6, window_bounds = array<i64: 128, 1>}]} {
    %c0 = arith.constant 0 : index
    %c0_0 = arith.constant 0 : index
    %0 = vector.load %arg1[%c0, %c0_0] : memref<128x128xf32, #tpu.memory_space<vmem>>, vector<128x128xf32>
    %1 = arith.truncf %0 : vector<128x128xf32> to vector<128x128xbf16>
    %c0_1 = arith.constant 0 : index
    %c0_2 = arith.constant 0 : index
    %2 = vector.load %arg2[%c0_1, %c0_2] : memref<128x128xbf16, #tpu.memory_space<vmem>>, vector<128x128xbf16>
    %cst = arith.constant dense<0.000000e+00> : vector<128x128xf32>
    %3 = tpu.matmul %1, %2, %cst {dimension_numbers = #tpu.dot_dimension_numbers<[1], [0], [0], [1], [0, 0, 1, 1], [], []>} : vector<128x128xbf16>, vector<128x128xbf16>, vector<128x128xf32> -> vector<128x128xf32>
    %4 = arith.truncf %3 : vector<128x128xf32> to vector<128x128xbf16>
    %c0_3 = arith.constant 0 : index
    %c0_4 = arith.constant 0 : index
    %5 = vector.load %arg5[%c0_3, %c0_4] : memref<128x128xbf16, #tpu.memory_space<vmem>>, vector<128x128xbf16>
    tpu.vector_store %arg5[%c0_3, %c0_4], %4 {strides = array<i32>} : memref<128x128xbf16, #tpu.memory_space<vmem>>, vector<128x128xbf16>,
    %c0_5 = arith.constant 0 : index
    %c0_6 = arith.constant 0 : index
    %6 = vector.load %arg3[%c0_5, %c0_6] : memref<1x128xf32, #tpu.memory_space<vmem>>, vector<1x128xf32>
    %7 = vector.broadcast %6 : vector<1x128xf32> to vector<128x128xf32>
    %8 = arith.mulf %3, %7 : vector<128x128xf32>
    %cst_7 = arith.constant dense<0.000000e+00> : vector<128xf32>
    %9 = vector.multi_reduction <add>, %8, %cst_7 [1] : vector<128x128xf32> to vector<128xf32>
    %10 = vector.shape_cast %9 : vector<128xf32> to vector<128x1xf32>
    %c0_8 = arith.constant 0 : index
    %c0_9 = arith.constant 0 : index
    %11 = vector.load %arg6[%c0_8, %c0_9] : memref<128x1xf32, #tpu.memory_space<vmem>>, vector<128x1xf32>
    tpu.vector_store %arg6[%c0_8, %c0_9], %10 {strides = array<i32>} : memref<128x1xf32, #tpu.memory_space<vmem>>, vector<128x1xf32>,
    %c0_10 = arith.constant 0 : index
    %c0_11 = arith.constant 0 : index
    %12 = vector.load %arg4[%c0_10, %c0_11] : memref<1x128xf32, #tpu.memory_space<vmem>>, vector<1x128xf32>
    %13 = vector.broadcast %12 : vector<1x128xf32> to vector<128x128xf32>
    %14 = arith.mulf %3, %13 : vector<128x128xf32>
    %cst_12 = arith.constant dense<0.000000e+00> : vector<128xf32>
    %15 = vector.multi_reduction <add>, %14, %cst_12 [1] : vector<128x128xf32> to vector<128xf32>
    %16 = vector.shape_cast %15 : vector<128xf32> to vector<128x1xf32>
    %c0_13 = arith.constant 0 : index
    %c0_14 = arith.constant 0 : index
    %17 = vector.load %arg7[%c0_13, %c0_14] : memref<128x1xf32, #tpu.memory_space<vmem>>, vector<128x1xf32>
    tpu.vector_store %arg7[%c0_13, %c0_14], %16 {strides = array<i32>} : memref<128x1xf32, #tpu.memory_space<vmem>>, vector<128x1xf32>,
    return
  }
  func.func @transform_0(%arg0: i32) -> (i32, i32) {
    %c0_i32 = arith.constant 0 : i32
    %c0_i32_0 = arith.constant 0 : i32
    return %arg0, %c0_i32 : i32, i32
  }
  func.func @transform_1(%arg0: i32) -> (i32, i32) {
    %c0_i32 = arith.constant 0 : i32
    %c0_i32_0 = arith.constant 0 : i32
    %c0_i32_1 = arith.constant 0 : i32
    return %c0_i32, %c0_i32_0 : i32, i32
  }
  func.func @transform_2(%arg0: i32) -> (i32, i32) {
    %c0_i32 = arith.constant 0 : i32
    %c0_i32_0 = arith.constant 0 : i32
    %c0_i32_1 = arith.constant 0 : i32
    return %c0_i32, %c0_i32_0 : i32, i32
  }
  func.func @transform_3(%arg0: i32) -> (i32, i32) {
    %c0_i32 = arith.constant 0 : i32
    %c0_i32_0 = arith.constant 0 : i32
    %c0_i32_1 = arith.constant 0 : i32
    return %c0_i32, %c0_i32_0 : i32, i32
  }
  func.func @transform_4(%arg0: i32) -> (i32, i32) {
    %c0_i32 = arith.constant 0 : i32
    %c0_i32_0 = arith.constant 0 : i32
    return %arg0, %c0_i32 : i32, i32
  }
  func.func @transform_5(%arg0: i32) -> (i32, i32) {
    %c0_i32 = arith.constant 0 : i32
    %c0_i32_0 = arith.constant 0 : i32
    return %arg0, %c0_i32 : i32, i32
  }
  func.func @transform_6(%arg0: i32) -> (i32, i32) {
    %c0_i32 = arith.constant 0 : i32
    %c0_i32_0 = arith.constant 0 : i32
    return %arg0, %c0_i32 : i32, i32
  }
}

</mosaic_0001>

<bundles_post_ra>
// kernel: tpu_custom_call.1
= control target key start
LH: loop header
LB: loop body
LE: loop exit
PB: predicated region body
PF: predicated region fallthrough
CT: control target
= control target key end

     0   :  { %12 = vsyncpa [#allocation3], 0  ;;  %s950_s0 = inlined_call_operand.hbm [shape: f32[128,128], index: 0, kind: input, shape index: {}]   ;;  %s951_s1 = inlined_call_operand.hbm [shape: bf16[128,128], index: 1, kind: input, shape index: {}]   ;;  %s952_s2 = inlined_call_operand.vmem [shape: f32[1,128], index: 2, kind: input, shape index: {}]   ;;  %s953_s3 = inlined_call_operand.vmem [shape: f32[1,128], index: 3, kind: input, shape index: {}]   ;;  %s954_s4 = inlined_call_operand.hbm [shape: bf16[128,128], index: 4, kind: output, shape index: {0}]   ;;  %s955_s5 = inlined_call_operand.vmem [shape: f32[128,1], index: 5, kind: output, shape index: {1}]   ;;  %s956_s6 = inlined_call_operand.vmem [shape: f32[128,1], index: 6, kind: output, shape index: {2}]  }
   0x1   :  { %13 = vsyncpa [#allocation6], 0 }
   0x2   :  { %14 = vsyncpa [#allocation4], 0  ;;  %s718_s21 = smov [#allocation2]  }
   0x3   :  { %s20_s22 = sshll.u32 %s718_s21, 4  ;;  %s21_s22 = int_to_ptr.vmem [resolvable:$true] %s20_s22 }
   0x4   :  { %s660_s23 = scalar_lea.vmem %s21_s22, 2048  ;;  %p665_p1 = scmp.lt.s32.totalorder %s21_s22, %s21_s22 }
   0x5   :  { %p661_p0 = scmp.ne.s32.totalorder %s21_s22, %s660_s23  ;;  %p666_p2 = scmp.lt.s32.totalorder %s660_s23, %s660_s23 }
   0x7   :  { %p667_p3 = por %p666_p2, %p665_p1 }
   0x9   :  { %p668_p4 = pnand %p667_p3, %p661_p0 }
   0xb   :  { %671 = shalt.err (!%p668_p4)
}
   0xc   :  { %s719_s24 = smov 128   ;;  %s720_s25 = smov 8  }
   0xd   :  { %26 = dma.hbm_to_vmem [thread:$0]  %s950_s0, 2048, %s21_s22, [#allocation3], %s719_s24, %s719_s24, %s720_s25  }
   0xe   :  { %s721_s28 = smov [#allocation5]  }
   0xf   :  { %s32_s29 = sshll.u32 %s721_s28, 4  ;;  %s33_s29 = int_to_ptr.vmem [resolvable:$true] %s32_s29 }
  0x10   :  { %s680_s30 = scalar_lea.vmem %s33_s29, 1024  ;;  %p685_p6 = scmp.lt.s32.totalorder %s33_s29, %s33_s29 }
  0x11   :  { %p681_p5 = scmp.ne.s32.totalorder %s33_s29, %s680_s30  ;;  %p686_p7 = scmp.lt.s32.totalorder %s680_s30, %s680_s30 }
  0x13   :  { %p687_p8 = por %p686_p7, %p685_p6 }
  0x15   :  { %p688_p9 = pnand %p687_p8, %p681_p5 }
  0x17   :  { %691 = shalt.err (!%p688_p9)
}
  0x18   :  { %s722_s7 = smov 64   ;;  %s723_s8 = smov 4  }
  0x19   :  { %38 = dma.hbm_to_vmem [thread:$0]  %s951_s1, 1024, %s33_s29, [#allocation6], %s722_s7, %s722_s7, %s723_s8  }
  0x1a   :  { %712 = dma.done.wait [#allocation3], 2048  }
  0x1b   :  { %713 = vsyncadd [#allocation3], 4294965248 }
  0x1c   :  { %714 = dma.done.wait [#allocation6], 1024  }
  0x1d   :  { %715 = vsyncadd [#allocation6], 4294966272  ;;  %v644_v0 = vld [vmem:[#allocation5 + $0x38] sm:$0xff]   ;;  %v645_v1 = vld [vmem:[#allocation5 + $0x30] sm:$0xff]  }
  0x1e   :  { %589 = vmatprep.subr.bf16.mxu0 %v644_v0  ;;  %621 = vmatprep.subr.bf16.mxu1 %v644_v0  ;;  %v646_v2 = vld [vmem:[#allocation5 + $0x28] sm:$0xff]   ;;  %v647_v3 = vld [vmem:[#allocation5 + $0x20] sm:$0xff]   ;;  %v648_v10 = vld [vmem:[#allocation5 + $0x18] sm:$0xff]  }
  0x1f   :  { %590 = vmatpush3.bf16.msra.mxu0 %v644_v0  ;;  %629 = vmatpush3.bf16.msra.mxu1 %v644_v0  ;;  %v50_v4 = vld [vmem:[#allocation2] sm:$0xff]  ;;  %v51_v5 = vld [vmem:[#allocation2 + $0x8] sm:$0xff]  ;;  %v649_v11 = vld [vmem:[#allocation5 + $0x10] sm:$0xff]  }
  0x20   :  { %591 = vmatprep.subr.bf16.mxu0 %v645_v1  ;;  %622 = vmatprep.subr.bf16.mxu1 %v645_v1  ;;  %v58_v6 = vld [vmem:[#allocation2 + $0x40] sm:$0xff]  ;;  %v66_v7 = vpack.c.bf16 %v51_v5, %v50_v4  ;;  %v59_v8 = vld [vmem:[#allocation2 + $0x48] sm:$0xff]  ;;  %v52_v14 = vld [vmem:[#allocation2 + $0x10] sm:$0xff] }
  0x21   :  { %v70_v9 = vpack.c.bf16 %v59_v8, %v58_v6  ;;  %v650_v12 = vld [vmem:[#allocation5 + $0x8] sm:$0xff]   ;;  %v651_v13 = vld [vmem:[#allocation5] sm:$0xff]   ;;  %v53_v15 = vld [vmem:[#allocation2 + $0x18] sm:$0xff] }
  0x22   :  { %605 = vmatprep.mubr.bf16.mxu0 %v66_v7  ;;  %v60_v16 = vld [vmem:[#allocation2 + $0x50] sm:$0xff]  ;;  %v61_v17 = vld [vmem:[#allocation2 + $0x58] sm:$0xff]  ;;  %v54_v18 = vld [vmem:[#allocation2 + $0x20] sm:$0xff]  ;;  %v67_v22 = vpack.c.bf16 %v53_v15, %v52_v14 }
  0x23   :  { %592 = vmatpush3.bf16.msra.mxu0 %v645_v1  ;;  %630 = vmatpush3.bf16.msra.mxu1 %v645_v1  ;;  %v55_v19 = vld [vmem:[#allocation2 + $0x28] sm:$0xff]  ;;  %v62_v20 = vld [vmem:[#allocation2 + $0x60] sm:$0xff]  ;;  %v71_v23 = vpack.c.bf16 %v61_v17, %v60_v16  ;;  %v56_v26 = vld [vmem:[#allocation2 + $0x30] sm:$0xff] }
  0x24   :  { %593 = vmatprep.subr.bf16.mxu0 %v646_v2  ;;  %623 = vmatprep.subr.bf16.mxu1 %v646_v2  ;;  %v63_v21 = vld [vmem:[#allocation2 + $0x68] sm:$0xff]  ;;  %v68_v24 = vpack.c.bf16 %v55_v19, %v54_v18  ;;  %v57_v27 = vld [vmem:[#allocation2 + $0x38] sm:$0xff]  ;;  %v64_v28 = vld [vmem:[#allocation2 + $0x70] sm:$0xff] }
  0x25   :  { %613 = vmatprep.mubr.bf16.mxu1 %v70_v9  ;;  %v72_v25 = vpack.c.bf16 %v63_v21, %v62_v20  ;;  %v65_v29 = vld [vmem:[#allocation2 + $0x78] sm:$0xff]  ;;  %v69_v30 = vpack.c.bf16 %v57_v27, %v56_v26  ;;  %v772_v32 = vld [vmem:[%s952_s2] ss:$0 sm:$0xff]  ;;  %s724_s2 = smov [#allocation7]  }
  0x26   :  { %v73_v31 = vpack.c.bf16 %v65_v29, %v64_v28  ;;  %v779_v39 = vld [vmem:[%s953_s3] ss:$0 sm:$0xff]  ;;  %s463_s3 = sshll.u32 %s724_s2, 4  ;;  %s464_s3 = int_to_ptr.vmem [resolvable:$true] %s463_s3 }
  0x27   :  { %594 = vmatpush3.bf16.msra.mxu0 %v646_v2  ;;  %631 = vmatpush3.bf16.msra.mxu1 %v646_v2  ;;  %s692_s13 = scalar_lea.vmem %s464_s3, 1024  ;;  %p697_p11 = scmp.lt.s32.totalorder %s464_s3, %s464_s3 }
  0x28   :  { %595 = vmatprep.subr.bf16.mxu0 %v647_v3  ;;  %624 = vmatprep.subr.bf16.mxu1 %v647_v3  ;;  %p693_p10 = scmp.ne.s32.totalorder %s464_s3, %s692_s13  ;;  %p698_p12 = scmp.lt.s32.totalorder %s692_s13, %s692_s13 }
  0x2a   :  { %p699_p13 = por %p698_p12, %p697_p11 }
  0x2b   :  { %596 = vmatpush3.bf16.msra.mxu0 %v647_v3  ;;  %632 = vmatpush3.bf16.msra.mxu1 %v647_v3 }
  0x2c   :  { %597 = vmatprep.subr.bf16.mxu0 %v648_v10  ;;  %625 = vmatprep.subr.bf16.mxu1 %v648_v10  ;;  %p700_p0 = pnand %p699_p13, %p693_p10 }
  0x2f   :  { %598 = vmatpush3.bf16.msra.mxu0 %v648_v10  ;;  %633 = vmatpush3.bf16.msra.mxu1 %v648_v10 }
  0x30   :  { %599 = vmatprep.subr.bf16.mxu0 %v649_v11  ;;  %626 = vmatprep.subr.bf16.mxu1 %v649_v11 }
  0x33   :  { %600 = vmatpush3.bf16.msra.mxu0 %v649_v11  ;;  %634 = vmatpush3.bf16.msra.mxu1 %v649_v11 }
  0x34   :  { %601 = vmatprep.subr.bf16.mxu0 %v650_v12  ;;  %627 = vmatprep.subr.bf16.mxu1 %v650_v12 }
  0x37   :  { %602 = vmatpush3.bf16.msra.mxu0 %v650_v12  ;;  %635 = vmatpush3.bf16.msra.mxu1 %v650_v12 }
  0x38   :  { %603 = vmatprep.subr.bf16.mxu0 %v651_v13  ;;  %628 = vmatprep.subr.bf16.mxu1 %v651_v13 }
  0x3b   :  { %604 = vmatpush3.bf16.msra.mxu0 %v651_v13  ;;  %636 = vmatpush3.bf16.msra.mxu1 %v651_v13 }
  0x3e   :  { %606 = vmatmul.mubr.bf16.vlgmr.msra.gmra.mxu0 %v67_v22  ;;  %614 = vmatmul.mubr.bf16.vlgmr.msra.gmra.mxu1 %v71_v23 }
  0x3f   :  { %609 = vmatprep.mubr.bf16.mxu0 %v68_v24  ;;  %617 = vmatprep.mubr.bf16.mxu1 %v72_v25 }
  0x46   :  { %610 = vmatmul.mubr.bf16.gmra.mxu0 %v69_v30  ;;  %618 = vmatmul.mubr.bf16.gmra.mxu1 %v73_v31 }
  0xfe   :  { %v607_v33 = vpop.f32.mrf.mxu0  ;;  %v615_v34 = vpop.f32.mrf.mxu1 }
  0xff   :  { %v332_v35 = vmul.f32 %v615_v34, %v772_v32  ;;  %v324_v36 = vmul.f32 %v607_v33, %v772_v32  ;;  %v396_v44 = vmul.f32 %v607_v33, %v779_v39  ;;  %v404_v52 = vmul.f32 %v615_v34, %v779_v39 }
 0x100   :  { %v172_v37 = vpop.f32.mrf.mxu0  ;;  %v204_v38 = vpop.f32.mrf.mxu1 }
 0x101   :  { %358 = vadd.xlane.f32.xlu0 %v332_v35  ;;  %342 = vadd.xlane.f32.xlu1 %v324_v36  ;;  %v322_v58 = vmul.f32 %v772_v32, %v172_v37  ;;  %v330_v2 = vmul.f32 %v772_v32, %v204_v38  ;;  %v394_v4 = vmul.f32 %v779_v39, %v172_v37 }
 0x102   :  { %v608_v40 = vpop.f32.mrf.mxu0  ;;  %v616_v41 = vpop.f32.mrf.mxu1  ;;  %v402_v6 = vmul.f32 %v779_v39, %v204_v38 }
 0x103   :  { %v534_v42 = vpack.c.bf16 %v608_v40, %v607_v33  ;;  %v554_v43 = vpack.c.bf16 %v616_v41, %v615_v34  ;;  %v325_v45 = vmul.f32 %v608_v40, %v772_v32  ;;  %v333_v53 = vmul.f32 %v616_v41, %v772_v32 }
 0x104   :  { %v175_v46 = vpop.f32.mrf.mxu0  ;;  %v207_v47 = vpop.f32.mrf.mxu1  ;;  %v397_v59 = vmul.f32 %v608_v40, %v779_v39  ;;  %v405_v3 = vmul.f32 %v616_v41, %v779_v39 }
 0x105   :  { %566 = vst [vmem:[#allocation7 + $0x8] sm:$0xff] %v534_v42   ;;  %570 = vst [vmem:[#allocation7 + $0x28] sm:$0xff] %v554_v43   ;;  %v529_v48 = vpack.c.bf16 %v175_v46, %v172_v37  ;;  %v549_v49 = vpack.c.bf16 %v207_v47, %v204_v38  ;;  %414 = vadd.xlane.f32.xlu0 %v396_v44  ;;  %344 = vadd.xlane.f32.xlu1 %v325_v45 }
 0x106   :  { %v611_v50 = vpop.f32.mrf.mxu0  ;;  %v783_v51 = vpop.f32.mrf.mxu1  ;;  %v331_v5 = vmul.f32 %v772_v32, %v207_v47  ;;  %v395_v7 = vmul.f32 %v779_v39, %v175_v46  ;;  %v403_v8 = vmul.f32 %v779_v39, %v207_v47  ;;  %v323_v9 = vmul.f32 %v772_v32, %v175_v46 }
 0x107   :  { %530 = vst [vmem:[#allocation7] sm:$0xff] %v529_v48   ;;  %569 = vst [vmem:[#allocation7 + $0x20] sm:$0xff] %v549_v49   ;;  %v328_v10 = vmul.f32 %v611_v50, %v772_v32  ;;  %v336_v12 = vmul.f32 %v783_v51, %v772_v32  ;;  %v400_v14 = vmul.f32 %v611_v50, %v779_v39 }
 0x108   :  { %v188_v54 = vpop.f32.mrf.mxu0  ;;  %v220_v55 = vpop.f32.mrf.mxu1  ;;  %v408_v24 = vmul.f32 %v783_v51, %v779_v39 }
 0x109   :  { %430 = vadd.xlane.f32.xlu0 %v404_v52  ;;  %360 = vadd.xlane.f32.xlu1 %v333_v53  ;;  %v326_v16 = vmul.f32 %v772_v32, %v188_v54  ;;  %v334_v18 = vmul.f32 %v772_v32, %v220_v55  ;;  %v398_v20 = vmul.f32 %v779_v39, %v188_v54 }
 0x10a   :  { %v612_v56 = vpop.f32.mrf.mxu0  ;;  %v620_v57 = vpop.f32.mrf.mxu1  ;;  %v406_v22 = vmul.f32 %v779_v39, %v220_v55 }
 0x10b   :  { %v544_v60 = vpack.c.bf16 %v612_v56, %v611_v50  ;;  %v564_v61 = vpack.c.bf16 %v620_v57, %v783_v51  ;;  %v329_v11 = vmul.f32 %v612_v56, %v772_v32  ;;  %v337_v13 = vmul.f32 %v620_v57, %v772_v32 }
 0x10c   :  { %v191_v62 = vpop.f32.mrf.mxu0  ;;  %v223_v63 = vpop.f32.mrf.mxu1  ;;  %v401_v15 = vmul.f32 %v612_v56, %v779_v39  ;;  %v409_v25 = vmul.f32 %v620_v57, %v779_v39 }
 0x10d   :  { %338 = vadd.xlane.f32.xlu0 %v322_v58  ;;  %416 = vadd.xlane.f32.xlu1 %v397_v59  ;;  %568 = vst [vmem:[#allocation7 + $0x18] sm:$0xff] %v544_v60   ;;  %v539_v0 = vpack.c.bf16 %v191_v62, %v188_v54  ;;  %572 = vst [vmem:[#allocation7 + $0x38] sm:$0xff] %v564_v61   ;;  %v559_v1 = vpack.c.bf16 %v223_v63, %v220_v55 }
 0x10e   :  { %v327_v17 = vmul.f32 %v772_v32, %v191_v62  ;;  %v335_v19 = vmul.f32 %v772_v32, %v223_v63  ;;  %v399_v21 = vmul.f32 %v779_v39, %v191_v62  ;;  %v407_v23 = vmul.f32 %v779_v39, %v223_v63 }
 0x10f   :  { %567 = vst [vmem:[#allocation7 + $0x10] sm:$0xff] %v539_v0   ;;  %571 = vst [vmem:[#allocation7 + $0x30] sm:$0xff] %v559_v1  }
 0x111   :  { %354 = vadd.xlane.f32.xlu0 %v330_v2  ;;  %432 = vadd.xlane.f32.xlu1 %v405_v3 }
 0x115   :  { %410 = vadd.xlane.f32.xlu0 %v394_v4  ;;  %356 = vadd.xlane.f32.xlu1 %v331_v5 }
 0x119   :  { %426 = vadd.xlane.f32.xlu0 %v402_v6  ;;  %412 = vadd.xlane.f32.xlu1 %v395_v7 }
 0x11d   :  { %428 = vadd.xlane.f32.xlu1 %v403_v8  ;;  %340 = vadd.xlane.f32.xlu0 %v323_v9 }
 0x121   :  { %350 = vadd.xlane.f32.xlu0 %v328_v10  ;;  %352 = vadd.xlane.f32.xlu1 %v329_v11 }
 0x125   :  { %366 = vadd.xlane.f32.xlu0 %v336_v12  ;;  %368 = vadd.xlane.f32.xlu1 %v337_v13 }
 0x129   :  { %422 = vadd.xlane.f32.xlu0 %v400_v14  ;;  %424 = vadd.xlane.f32.xlu1 %v401_v15 }
 0x12d   :  { %346 = vadd.xlane.f32.xlu0 %v326_v16  ;;  %348 = vadd.xlane.f32.xlu1 %v327_v17 }
 0x131   :  { %362 = vadd.xlane.f32.xlu0 %v334_v18  ;;  %364 = vadd.xlane.f32.xlu1 %v335_v19 }
 0x135   :  { %418 = vadd.xlane.f32.xlu0 %v398_v20  ;;  %420 = vadd.xlane.f32.xlu1 %v399_v21 }
 0x139   :  { %434 = vadd.xlane.f32.xlu0 %v406_v22  ;;  %436 = vadd.xlane.f32.xlu1 %v407_v23 }
 0x13d   :  { %438 = vadd.xlane.f32.xlu0 %v408_v24  ;;  %440 = vadd.xlane.f32.xlu1 %v409_v25 }
 0x13e   :  { %703 = shalt.err (!%p700_p0)
}
 0x13f   :  { %469 = dma.vmem_to_hbm [thread:$0]  %s464_s3, 1024, %s954_s4, [#allocation4], %s722_s7, %s722_s7, %s723_s8   ;;  %vm370_vm0 = vcmask 7168  }
 0x18a   :  { %v359_v26 = vpop.xlane.xlu0 %358  ;;  %v343_v27 = vpop.xlane.xlu1 %342 }
 0x18b   :  { %381 = vst.msk [vmem:[%s955_s5 + $0x50] sm:$0xff] %vm370_vm0, %v359_v26  ;;  %373 = vst.msk [vmem:[%s955_s5 + $0x10] sm:$0xff] %vm370_vm0, %v343_v27 }
 0x18e   :  { %v415_v28 = vpop.xlane.xlu0 %414  ;;  %v345_v29 = vpop.xlane.xlu1 %344 }
 0x18f   :  { %444 = vst.msk [vmem:[%s956_s6 + $0x10] sm:$0xff] %vm370_vm0, %v415_v28  ;;  %374 = vst.msk [vmem:[%s955_s5 + $0x18] sm:$0xff] %vm370_vm0, %v345_v29 }
 0x192   :  { %v431_v30 = vpop.xlane.xlu0 %430  ;;  %v361_v31 = vpop.xlane.xlu1 %360 }
 0x193   :  { %452 = vst.msk [vmem:[%s956_s6 + $0x50] sm:$0xff] %vm370_vm0, %v431_v30  ;;  %382 = vst.msk [vmem:[%s955_s5 + $0x58] sm:$0xff] %vm370_vm0, %v361_v31 }
 0x196   :  { %v339_v32 = vpop.xlane.xlu0 %338  ;;  %v417_v33 = vpop.xlane.xlu1 %416 }
 0x197   :  { %371 = vst.msk [vmem:[%s955_s5] sm:$0xff] %vm370_vm0, %v339_v32  ;;  %445 = vst.msk [vmem:[%s956_s6 + $0x18] sm:$0xff] %vm370_vm0, %v417_v33 }
 0x19a   :  { %v355_v34 = vpop.xlane.xlu0 %354  ;;  %v433_v35 = vpop.xlane.xlu1 %432 }
 0x19b   :  { %379 = vst.msk [vmem:[%s955_s5 + $0x40] sm:$0xff] %vm370_vm0, %v355_v34  ;;  %453 = vst.msk [vmem:[%s956_s6 + $0x58] sm:$0xff] %vm370_vm0, %v433_v35 }
 0x19e   :  { %v411_v36 = vpop.xlane.xlu0 %410  ;;  %v357_v37 = vpop.xlane.xlu1 %356 }
 0x19f   :  { %442 = vst.msk [vmem:[%s956_s6] sm:$0xff] %vm370_vm0, %v411_v36  ;;  %380 = vst.msk [vmem:[%s955_s5 + $0x48] sm:$0xff] %vm370_vm0, %v357_v37 }
 0x1a2   :  { %v427_v38 = vpop.xlane.xlu0 %426  ;;  %v413_v39 = vpop.xlane.xlu1 %412 }
 0x1a3   :  { %450 = vst.msk [vmem:[%s956_s6 + $0x40] sm:$0xff] %vm370_vm0, %v427_v38  ;;  %443 = vst.msk [vmem:[%s956_s6 + $0x8] sm:$0xff] %vm370_vm0, %v413_v39 }
 0x1a6   :  { %v429_v40 = vpop.xlane.xlu1 %428  ;;  %v341_v41 = vpop.xlane.xlu0 %340 }
 0x1a7   :  { %451 = vst.msk [vmem:[%s956_s6 + $0x48] sm:$0xff] %vm370_vm0, %v429_v40  ;;  %372 = vst.msk [vmem:[%s955_s5 + $0x8] sm:$0xff] %vm370_vm0, %v341_v41 }
 0x1aa   :  { %v351_v42 = vpop.xlane.xlu0 %350  ;;  %v353_v43 = vpop.xlane.xlu1 %352 }
 0x1ab   :  { %377 = vst.msk [vmem:[%s955_s5 + $0x30] sm:$0xff] %vm370_vm0, %v351_v42  ;;  %378 = vst.msk [vmem:[%s955_s5 + $0x38] sm:$0xff] %vm370_vm0, %v353_v43 }
 0x1ae   :  { %v367_v44 = vpop.xlane.xlu0 %366  ;;  %v369_v45 = vpop.xlane.xlu1 %368 }
 0x1af   :  { %385 = vst.msk [vmem:[%s955_s5 + $0x70] sm:$0xff] %vm370_vm0, %v367_v44  ;;  %386 = vst.msk [vmem:[%s955_s5 + $0x78] sm:$0xff] %vm370_vm0, %v369_v45 }
 0x1b2   :  { %v423_v46 = vpop.xlane.xlu0 %422  ;;  %v425_v47 = vpop.xlane.xlu1 %424 }
 0x1b3   :  { %448 = vst.msk [vmem:[%s956_s6 + $0x30] sm:$0xff] %vm370_vm0, %v423_v46  ;;  %449 = vst.msk [vmem:[%s956_s6 + $0x38] sm:$0xff] %vm370_vm0, %v425_v47 }
 0x1b6   :  { %v347_v48 = vpop.xlane.xlu0 %346  ;;  %v349_v49 = vpop.xlane.xlu1 %348 }
 0x1b7   :  { %375 = vst.msk [vmem:[%s955_s5 + $0x20] sm:$0xff] %vm370_vm0, %v347_v48  ;;  %376 = vst.msk [vmem:[%s955_s5 + $0x28] sm:$0xff] %vm370_vm0, %v349_v49 }
 0x1ba   :  { %v363_v50 = vpop.xlane.xlu0 %362  ;;  %v365_v51 = vpop.xlane.xlu1 %364 }
 0x1bb   :  { %383 = vst.msk [vmem:[%s955_s5 + $0x60] sm:$0xff] %vm370_vm0, %v363_v50  ;;  %384 = vst.msk [vmem:[%s955_s5 + $0x68] sm:$0xff] %vm370_vm0, %v365_v51 }
 0x1be   :  { %v419_v52 = vpop.xlane.xlu0 %418  ;;  %v421_v53 = vpop.xlane.xlu1 %420 }
 0x1bf   :  { %446 = vst.msk [vmem:[%s956_s6 + $0x20] sm:$0xff] %vm370_vm0, %v419_v52  ;;  %447 = vst.msk [vmem:[%s956_s6 + $0x28] sm:$0xff] %vm370_vm0, %v421_v53 }
 0x1c2   :  { %v435_v54 = vpop.xlane.xlu0 %434  ;;  %v437_v55 = vpop.xlane.xlu1 %436 }
 0x1c3   :  { %454 = vst.msk [vmem:[%s956_s6 + $0x60] sm:$0xff] %vm370_vm0, %v435_v54  ;;  %455 = vst.msk [vmem:[%s956_s6 + $0x68] sm:$0xff] %vm370_vm0, %v437_v55 }
 0x1c6   :  { %v439_v56 = vpop.xlane.xlu0 %438  ;;  %v441_v57 = vpop.xlane.xlu1 %440 }
 0x1c7   :  { %456 = vst.msk [vmem:[%s956_s6 + $0x70] sm:$0xff] %vm370_vm0, %v439_v56  ;;  %457 = vst.msk [vmem:[%s956_s6 + $0x78] sm:$0xff] %vm370_vm0, %v441_v57 }
 0x1c8   :  { %716 = dma.done.wait [#allocation4], 1024  }
 0x1c9   :  { %717 = vsyncadd [#allocation4], 4294966272 }
 0x1ca   :  { %481 = vsyncpa [#allocation3], 1 }
 0x1cb   :  { %482 = vsyncpa [#allocation6], 1 }
 0x1cc   :  { %483 = vsyncpa [#allocation4], 1 }

</bundles_post_ra>
